<compile_context>
chip_gen: v5e
topology: v5e:2x2
jax: 0.10.0
libtpu: 0.0.40
codegen_flags: <defaults>
</compile_context>

<pallas_src>
import jax
import jax.numpy as jnp
from jax.experimental import pallas as pl
from jax.experimental.pallas import tpu as pltpu

IN_DIM = 784
HID_DIM = 200
OUT_DIM = 10

HID_PAD = 256   # lane-aligned hidden width
OUT_PAD = 128   # lane-aligned output width (kills masked vst.msk stores)

TILE_B_CAP = 1024  # multiple of 8; keeps double-buffered fp32 x tiles in VMEM


def _round_up(n, m):
    return (n + m - 1) // m * m


def _default_tile_b(B, cap=TILE_B_CAP):
    # Prefer >=2 grid steps when the batch allows it (megacore sharding on
    # v7x; harmless elsewhere), capped so fp32 x tiles stay VMEM-friendly.
    half = _round_up(pl.cdiv(B, 2), 8)
    return max(8, min(cap, half))


def mlp_kernel(x_ref, w1_ref, b1_ref, w2_ref, b2_ref, o_ref):
    # In-kernel fp32 -> bf16 cast of the activation tile (no extra HBM pass),
    # two bf16 MXU matmuls with fp32 accumulation, fp32 elementwise epilogue.
    x = x_ref[...].astype(jnp.bfloat16)                               # (TB, 784) bf16
    h = jnp.dot(x, w1_ref[...], preferred_element_type=jnp.float32)   # (TB, 256) f32
    h = jnp.maximum(h + b1_ref[...], 0.0)                             # bias + ReLU in f32
    y = jnp.dot(h.astype(jnp.bfloat16), w2_ref[...],
                preferred_element_type=jnp.float32)                   # (TB, 128) f32
    o_ref[...] = (y + b2_ref[...]).astype(o_ref.dtype)


def prepare_params(w1, b1, w2, b2):
    """One-time: pad to lane-aligned shapes, cast matmul weights to bf16."""
    w1p = jnp.zeros((IN_DIM, HID_PAD), jnp.bfloat16)
    w1p = w1p.at[:, :HID_DIM].set(w1.astype(jnp.bfloat16))
    b1p = jnp.zeros((1, HID_PAD), jnp.float32)
    b1p = b1p.at[:, :HID_DIM].set(b1.reshape(1, HID_DIM).astype(jnp.float32))
    w2p = jnp.zeros((HID_PAD, OUT_PAD), jnp.bfloat16)
    w2p = w2p.at[:HID_DIM, :OUT_DIM].set(w2.astype(jnp.bfloat16))
    b2p = jnp.zeros((1, OUT_PAD), jnp.float32)
    b2p = b2p.at[:, :OUT_DIM].set(b2.reshape(1, OUT_DIM).astype(jnp.float32))
    return w1p, b1p, w2p, b2p


def mlp_forward(x, w1p, b1p, w2p, b2p, tile_b=None):
    B, K = x.shape
    assert K == IN_DIM
    if tile_b is None:
        tile_b = _default_tile_b(B)

    grid = (pl.cdiv(B, tile_b),)  # last block clipped by Pallas; no batch padding

    flops = 2 * B * (IN_DIM * HID_PAD + HID_PAD * OUT_PAD)
    bytes_accessed = (x.size * 4                       # fp32 x read
                      + w1p.size * 2 + w2p.size * 2    # bf16 weights
                      + b1p.size * 4 + b2p.size * 4    # fp32 biases
                      + B * OUT_PAD * 4)               # fp32 output write

    out = pl.pallas_call(
        mlp_kernel,
        out_shape=jax.ShapeDtypeStruct((B, OUT_PAD), jnp.float32),
        grid_spec=pltpu.PrefetchScalarGridSpec(
            num_scalar_prefetch=0,
            grid=grid,
            in_specs=[
                pl.BlockSpec((tile_b, IN_DIM), lambda i: (i, 0)),    # x tile (pipelined, fp32)
                pl.BlockSpec((IN_DIM, HID_PAD), lambda i: (0, 0)),   # w1 resident (bf16)
                pl.BlockSpec((1, HID_PAD), lambda i: (0, 0)),        # b1 resident
                pl.BlockSpec((HID_PAD, OUT_PAD), lambda i: (0, 0)),  # w2 resident (bf16)
                pl.BlockSpec((1, OUT_PAD), lambda i: (0, 0)),        # b2 resident
            ],
            out_specs=pl.BlockSpec((tile_b, OUT_PAD), lambda i: (i, 0)),
        ),
        compiler_params=pltpu.CompilerParams(
            dimension_semantics=("parallel",),
            vmem_limit_bytes=32 * 1024 * 1024,  # fits big fp32 x tiles on v5e default-scoped; < v7x physical
        ),
        cost_estimate=pl.CostEstimate(
            flops=flops, transcendentals=0, bytes_accessed=bytes_accessed),
    )(x, w1p, b1p, w2p, b2p)

    # Keep this slice: padded output columns (10->128) are dropped here.
    return out[:, :OUT_DIM]


def init_params(key):
    k1, k2, k3, k4 = jax.random.split(key, 4)
    # Mimics nn.Linear's U(-1/sqrt(fan_in), 1/sqrt(fan_in)) init.
    lim1 = 1.0 / jnp.sqrt(float(IN_DIM))
    lim2 = 1.0 / jnp.sqrt(float(HID_DIM))
    w1 = jax.random.uniform(k1, (IN_DIM, HID_DIM), jnp.float32, -lim1, lim1)
    b1 = jax.random.uniform(k2, (HID_DIM,), jnp.float32, -lim1, lim1)
    w2 = jax.random.uniform(k3, (HID_DIM, OUT_DIM), jnp.float32, -lim2, lim2)
    b2 = jax.random.uniform(k4, (OUT_DIM,), jnp.float32, -lim2, lim2)
    return w1, b1, w2, b2


if __name__ == "__main__":
    key = jax.random.PRNGKey(0)
    kx, kp = jax.random.split(key)
    x = jax.random.normal(kx, (8, IN_DIM), jnp.float32)   # batch=8, features=784
    w1, b1, w2, b2 = init_params(kp)
    w1p, b1p, w2p, b2p = prepare_params(w1, b1, w2, b2)

    out = mlp_forward(x, w1p, b1p, w2p, b2p)
    out = jax.block_until_ready(out)

    # Reference with matching numerics (bf16 matmuls, fp32 accumulate/epilogue).
    xb = x.astype(jnp.bfloat16)
    h_ref = jnp.dot(xb, w1.astype(jnp.bfloat16),
                    preferred_element_type=jnp.float32) + b1
    h_ref = jnp.maximum(h_ref, 0.0)
    ref = jnp.dot(h_ref.astype(jnp.bfloat16), w2.astype(jnp.bfloat16),
                  preferred_element_type=jnp.float32) + b2

    assert out.shape == (8, OUT_DIM)
    assert jnp.allclose(out, ref, atol=1e-2, rtol=1e-2), (
        float(jnp.max(jnp.abs(out - ref))))
    print("KERNEL_OK")
</pallas_src>

<mosaic_0001>
module attributes {stable_mosaic.version = 11 : i64} {
  func.func @mlp_kernel(%arg0: i32, %arg1: memref<8x784xf32, #tpu.memory_space<vmem>>, %arg2: memref<784x256xbf16, #tpu.memory_space<vmem>>, %arg3: memref<1x256xf32, #tpu.memory_space<vmem>>, %arg4: memref<256x128xbf16, #tpu.memory_space<vmem>>, %arg5: memref<1x128xf32, #tpu.memory_space<vmem>>, %arg6: memref<8x128xf32, #tpu.memory_space<vmem>>) attributes {dimension_semantics = [#tpu.dimension_semantics<parallel>], iteration_bounds = array<i64: 1>, scalar_prefetch = 0 : i64, scratch_operands = 0 : i64, tpu.core_type = #tpu.core_type<tc>, window_params = [{transform_indices = @transform_0, window_bounds = array<i64: 8, 784>}, {pipeline_mode = #tpu.pipeline_mode<synchronous>, transform_indices = @transform_1, window_bounds = array<i64: 784, 256>}, {pipeline_mode = #tpu.pipeline_mode<synchronous>, transform_indices = @transform_2, window_bounds = array<i64: 1, 256>}, {pipeline_mode = #tpu.pipeline_mode<synchronous>, transform_indices = @transform_3, window_bounds = array<i64: 256, 128>}, {pipeline_mode = #tpu.pipeline_mode<synchronous>, transform_indices = @transform_4, window_bounds = array<i64: 1, 128>}, {transform_indices = @transform_5, window_bounds = array<i64: 8, 128>}]} {
    %c0 = arith.constant 0 : index
    %c0_0 = arith.constant 0 : index
    %0 = vector.load %arg1[%c0, %c0_0] : memref<8x784xf32, #tpu.memory_space<vmem>>, vector<8x784xf32>
    %1 = arith.truncf %0 : vector<8x784xf32> to vector<8x784xbf16>
    %c0_1 = arith.constant 0 : index
    %c0_2 = arith.constant 0 : index
    %2 = vector.load %arg2[%c0_1, %c0_2] : memref<784x256xbf16, #tpu.memory_space<vmem>>, vector<784x256xbf16>
    %cst = arith.constant dense<0.000000e+00> : vector<8x256xf32>
    %3 = tpu.matmul %1, %2, %cst {dimension_numbers = #tpu.dot_dimension_numbers<[1], [0], [0], [1], [0, 0, 1, 1], [], []>} : vector<8x784xbf16>, vector<784x256xbf16>, vector<8x256xf32> -> vector<8x256xf32>
    %c0_3 = arith.constant 0 : index
    %c0_4 = arith.constant 0 : index
    %4 = vector.load %arg3[%c0_3, %c0_4] : memref<1x256xf32, #tpu.memory_space<vmem>>, vector<1x256xf32>
    %5 = vector.broadcast %4 : vector<1x256xf32> to vector<8x256xf32>
    %6 = arith.addf %3, %5 : vector<8x256xf32>
    %cst_5 = arith.constant 0.000000e+00 : f32
    %7 = vector.broadcast %cst_5 : f32 to vector<8x256xf32>
    %8 = arith.maximumf %6, %7 : vector<8x256xf32>
    %9 = arith.truncf %8 : vector<8x256xf32> to vector<8x256xbf16>
    %c0_6 = arith.constant 0 : index
    %c0_7 = arith.constant 0 : index
    %10 = vector.load %arg4[%c0_6, %c0_7] : memref<256x128xbf16, #tpu.memory_space<vmem>>, vector<256x128xbf16>
    %cst_8 = arith.constant dense<0.000000e+00> : vector<8x128xf32>
    %11 = tpu.matmul %9, %10, %cst_8 {dimension_numbers = #tpu.dot_dimension_numbers<[1], [0], [0], [1], [0, 0, 1, 1], [], []>} : vector<8x256xbf16>, vector<256x128xbf16>, vector<8x128xf32> -> vector<8x128xf32>
    %c0_9 = arith.constant 0 : index
    %c0_10 = arith.constant 0 : index
    %12 = vector.load %arg5[%c0_9, %c0_10] : memref<1x128xf32, #tpu.memory_space<vmem>>, vector<1x128xf32>
    %13 = vector.broadcast %12 : vector<1x128xf32> to vector<8x128xf32>
    %14 = arith.addf %11, %13 : vector<8x128xf32>
    %c0_11 = arith.constant 0 : index
    %c0_12 = arith.constant 0 : index
    %15 = vector.load %arg6[%c0_11, %c0_12] : memref<8x128xf32, #tpu.memory_space<vmem>>, vector<8x128xf32>
    tpu.vector_store %arg6[%c0_11, %c0_12], %14 {strides = array<i32>} : memref<8x128xf32, #tpu.memory_space<vmem>>, vector<8x128xf32>,
    return
  }
  func.func @transform_0(%arg0: i32) -> (i32, i32) {
    %c0_i32 = arith.constant 0 : i32
    %c0_i32_0 = arith.constant 0 : i32
    return %arg0, %c0_i32 : i32, i32
  }
  func.func @transform_1(%arg0: i32) -> (i32, i32) {
    %c0_i32 = arith.constant 0 : i32
    %c0_i32_0 = arith.constant 0 : i32
    %c0_i32_1 = arith.constant 0 : i32
    return %c0_i32, %c0_i32_0 : i32, i32
  }
  func.func @transform_2(%arg0: i32) -> (i32, i32) {
    %c0_i32 = arith.constant 0 : i32
    %c0_i32_0 = arith.constant 0 : i32
    %c0_i32_1 = arith.constant 0 : i32
    return %c0_i32, %c0_i32_0 : i32, i32
  }
  func.func @transform_3(%arg0: i32) -> (i32, i32) {
    %c0_i32 = arith.constant 0 : i32
    %c0_i32_0 = arith.constant 0 : i32
    %c0_i32_1 = arith.constant 0 : i32
    return %c0_i32, %c0_i32_0 : i32, i32
  }
  func.func @transform_4(%arg0: i32) -> (i32, i32) {
    %c0_i32 = arith.constant 0 : i32
    %c0_i32_0 = arith.constant 0 : i32
    %c0_i32_1 = arith.constant 0 : i32
    return %c0_i32, %c0_i32_0 : i32, i32
  }
  func.func @transform_5(%arg0: i32) -> (i32, i32) {
    %c0_i32 = arith.constant 0 : i32
    %c0_i32_0 = arith.constant 0 : i32
    return %arg0, %c0_i32 : i32, i32
  }
}

</mosaic_0001>

<bundles_post_ra>
// kernel: tpu_custom_call.1
= control target key start
LH: loop header
LB: loop body
LE: loop exit
PB: predicated region body
PF: predicated region fallthrough
CT: control target
= control target key end

     0   :  { %10 = vsyncpa [#allocation3], 0  ;;  %s1854_s0 = inlined_call_operand.hbm [shape: f32[8,784], index: 0, kind: input, shape index: {}]   ;;  %s1855_s1 = inlined_call_operand.hbm [shape: bf16[784,256], index: 1, kind: input, shape index: {}]   ;;  %s1856_s2 = inlined_call_operand.hbm [shape: f32[1,256], index: 2, kind: input, shape index: {}]   ;;  %s1857_s3 = inlined_call_operand.hbm [shape: bf16[256,128], index: 3, kind: input, shape index: {}]   ;;  %s1858_s4 = inlined_call_operand.vmem [shape: f32[1,128], index: 4, kind: input, shape index: {}]   ;;  %s1859_s5 = inlined_call_operand.hbm [shape: f32[8,128], index: 5, kind: output, shape index: {}]  }
   0x1   :  { %11 = vsyncpa [#allocation6], 0 }
   0x2   :  { %12 = vsyncpa [#allocation9], 0  ;;  %s29_s20 = sshll.u32 %s1855_s1, 4  ;;  %s30_s20 = int_to_ptr.hbm [resolvable:$true] %s29_s20 }
   0x3   :  { %13 = vsyncpa [#allocation4], 0  ;;  %s1767_s21 = smov [#allocation5]   ;;  %s19_s25 = sshll.u32 %s1854_s0, 4  ;;  %s20_s25 = int_to_ptr.hbm [resolvable:$true] %s19_s25 }
   0x4   :  { %s31_s22 = sshll.u32 %s1767_s21, 4  ;;  %s1768_s26 = smov 128   ;;  %s32_s22 = int_to_ptr.vmem [resolvable:$true] %s31_s22 }
   0x5   :  { %s1769_s27 = smov 8   ;;  %s1770_s28 = smov [#allocation2]  }
   0x6   :  { %37 = dma.hbm_to_vmem [thread:$0]  %s30_s20, 12544, %s32_s22, [#allocation6], %s1768_s26, %s1768_s26, %s1769_s27  }
   0x7   :  { %s21_s29 = sshll.u32 %s1770_s28, 4  ;;  %s43_s7 = sshll.u32 %s1856_s2, 4  ;;  %s22_s29 = int_to_ptr.vmem [resolvable:$true] %s21_s29  ;;  %s44_s7 = int_to_ptr.hbm [resolvable:$true] %s43_s7 }
   0x8   :  { %24 = dma.hbm_to_vmem [thread:$0]  %s20_s25, 896, %s22_s29, [#allocation3]  }
   0x9   :  { %s53_s9 = sshll.u32 %s1857_s3, 4  ;;  %s1771_s10 = smov [#allocation7]   ;;  %s54_s9 = int_to_ptr.hbm [resolvable:$true] %s53_s9 }
   0xa   :  { %s45_s11 = sshll.u32 %s1771_s10, 4  ;;  %s1772_s0 = smov [#allocation8]   ;;  %s46_s11 = int_to_ptr.vmem [resolvable:$true] %s45_s11 }
   0xb   :  { %48 = dma.hbm_to_vmem [thread:$0]  %s44_s7, 32, %s46_s11, [#allocation6]  }
   0xc   :  { %s55_s12 = sshll.u32 %s1772_s0, 4  ;;  %s1773_s13 = smov 64   ;;  %s56_s12 = int_to_ptr.vmem [resolvable:$true] %s55_s12 }
   0xd   :  { %s1774_s14 = smov 4  }
   0xe   :  { %61 = dma.hbm_to_vmem [thread:$0]  %s54_s9, 2048, %s56_s12, [#allocation9], %s1773_s13, %s1773_s13, %s1774_s14  }
   0xf   :  { %1759 = dma.done.wait [#allocation3], 896  }
  0x10   :  { %1760 = vsyncadd [#allocation3], 4294966400 }
  0x11   :  { %1761 = dma.done.wait [#allocation6], 12576  }
  0x12   :  { %1762 = vsyncadd [#allocation6], 4294954720 }
  0x13   :  { %1763 = dma.done.wait [#allocation9], 2048  }
  0x14   :  { %1764 = vsyncadd [#allocation9], 4294965248  ;;  %v1115_v0 = vld [vmem:[#allocation5 + $0x70] sm:$0xf]  ;;  %v1530_v1 = vld [vmem:[#allocation5 + $0x74] sm:$0xf0] }
  0x15   :  { %v1243_v2 = vld [vmem:[#allocation5 + $0x170] sm:$0xf]  ;;  %v1116_v3 = vor.u32 %v1530_v1, %v1115_v0  ;;  %v1562_v4 = vld [vmem:[#allocation5 + $0x174] sm:$0xf0]  ;;  %v1107_v11 = vld [vmem:[#allocation5 + $0x60] sm:$0xf] }
  0x16   :  { %v1307_v5 = vld [vmem:[#allocation5 + $0x1f0] sm:$0xf]  ;;  %v1578_v6 = vld [vmem:[#allocation5 + $0x1f4] sm:$0xf0]  ;;  %v1244_v7 = vor.u32 %v1562_v4, %v1243_v2  ;;  %v1528_v13 = vld [vmem:[#allocation5 + $0x64] sm:$0xf0] }
  0x17   :  { %v1308_v8 = vor.u32 %v1578_v6, %v1307_v5  ;;  %v1179_v9 = vld [vmem:[#allocation5 + $0xf0] sm:$0xf]  ;;  %v1546_v10 = vld [vmem:[#allocation5 + $0xf4] sm:$0xf0]  ;;  %693 = vmatpush.bf16.msra.mxu0 %v1116_v3  ;;  %v1235_v14 = vld [vmem:[#allocation5 + $0x160] sm:$0xf]  ;;  %v1108_v16 = vor.u32 %v1528_v13, %v1107_v11 }
  0x18   :  { %v1180_v12 = vor.u32 %v1546_v10, %v1179_v9  ;;  %v1560_v15 = vld [vmem:[#allocation5 + $0x164] sm:$0xf0]  ;;  %719 = vmatpush.bf16.msra.mxu2 %v1244_v7  ;;  %v1299_v18 = vld [vmem:[#allocation5 + $0x1e0] sm:$0xf]  ;;  %v1099_v23 = vld [vmem:[#allocation5 + $0x50] sm:$0xf] }
  0x19   :  { %732 = vmatpush.bf16.msra.mxu3 %v1308_v8  ;;  %v1236_v17 = vor.u32 %v1560_v15, %v1235_v14  ;;  %v1576_v19 = vld [vmem:[#allocation5 + $0x1e4] sm:$0xf0]  ;;  %v1171_v20 = vld [vmem:[#allocation5 + $0xe0] sm:$0xf]  ;;  %v1526_v24 = vld [vmem:[#allocation5 + $0x54] sm:$0xf0] }
  0x1a   :  { %706 = vmatpush.bf16.msra.mxu1 %v1180_v12  ;;  %v1300_v21 = vor.u32 %v1576_v19, %v1299_v18  ;;  %v1544_v22 = vld [vmem:[#allocation5 + $0xe4] sm:$0xf0]  ;;  %v1227_v26 = vld [vmem:[#allocation5 + $0x150] sm:$0xf]  ;;  %v1558_v27 = vld [vmem:[#allocation5 + $0x154] sm:$0xf0]  ;;  %v1100_v29 = vor.u32 %v1526_v24, %v1099_v23 }
  0x1b   :  { %v1172_v25 = vor.u32 %v1544_v22, %v1171_v20  ;;  %v1291_v28 = vld [vmem:[#allocation5 + $0x1d0] sm:$0xf]  ;;  %694 = vmatpush.bf16.msra.mxu0 %v1108_v16  ;;  %v1574_v30 = vld [vmem:[#allocation5 + $0x1d4] sm:$0xf0]  ;;  %v1228_v33 = vor.u32 %v1558_v27, %v1227_v26  ;;  %v1091_v35 = vld [vmem:[#allocation5 + $0x40] sm:$0xf] }
  0x1c   :  { %v1163_v31 = vld [vmem:[#allocation5 + $0xd0] sm:$0xf]  ;;  %v1542_v32 = vld [vmem:[#allocation5 + $0xd4] sm:$0xf0]  ;;  %720 = vmatpush.bf16.msra.mxu2 %v1236_v17  ;;  %v1292_v34 = vor.u32 %v1574_v30, %v1291_v28  ;;  %v1524_v36 = vld [vmem:[#allocation5 + $0x44] sm:$0xf0] }
  0x1d   :  { %733 = vmatpush.bf16.msra.mxu3 %v1300_v21  ;;  %v1219_v37 = vld [vmem:[#allocation5 + $0x140] sm:$0xf]  ;;  %v1164_v38 = vor.u32 %v1542_v32, %v1163_v31  ;;  %v1556_v39 = vld [vmem:[#allocation5 + $0x144] sm:$0xf0]  ;;  %v1092_v44 = vor.u32 %v1524_v36, %v1091_v35  ;;  %v1083_v47 = vld [vmem:[#allocation5 + $0x30] sm:$0xf] }
  0x1e   :  { %707 = vmatpush.bf16.msra.mxu1 %v1172_v25  ;;  %v1283_v40 = vld [vmem:[#allocation5 + $0x1c0] sm:$0xf]  ;;  %v1572_v41 = vld [vmem:[#allocation5 + $0x1c4] sm:$0xf0]  ;;  %v1220_v45 = vor.u32 %v1556_v39, %v1219_v37  ;;  %v1522_v48 = vld [vmem:[#allocation5 + $0x34] sm:$0xf0] }
  0x1f   :  { %v1155_v42 = vld [vmem:[#allocation5 + $0xc0] sm:$0xf]  ;;  %v1540_v43 = vld [vmem:[#allocation5 + $0xc4] sm:$0xf0]  ;;  %695 = vmatpush.bf16.msra.mxu0 %v1100_v29  ;;  %v1284_v46 = vor.u32 %v1572_v41, %v1283_v40  ;;  %v1211_v49 = vld [vmem:[#allocation5 + $0x130] sm:$0xf]  ;;  %v1084_v56 = vor.u32 %v1522_v48, %v1083_v47 }
  0x20   :  { %721 = vmatpush.bf16.msra.mxu2 %v1228_v33  ;;  %v1156_v50 = vor.u32 %v1540_v43, %v1155_v42  ;;  %v1554_v51 = vld [vmem:[#allocation5 + $0x134] sm:$0xf0]  ;;  %v1275_v52 = vld [vmem:[#allocation5 + $0x1b0] sm:$0xf]  ;;  %v1075_v59 = vld [vmem:[#allocation5 + $0x20] sm:$0xf] }
  0x21   :  { %734 = vmatpush.bf16.msra.mxu3 %v1292_v34  ;;  %v1570_v53 = vld [vmem:[#allocation5 + $0x1b4] sm:$0xf0]  ;;  %v1147_v54 = vld [vmem:[#allocation5 + $0xb0] sm:$0xf]  ;;  %v1212_v57 = vor.u32 %v1554_v51, %v1211_v49  ;;  %v1520_v60 = vld [vmem:[#allocation5 + $0x24] sm:$0xf0] }
  0x22   :  { %708 = vmatpush.bf16.msra.mxu1 %v1164_v38  ;;  %v1538_v55 = vld [vmem:[#allocation5 + $0xb4] sm:$0xf0]  ;;  %v1276_v58 = vor.u32 %v1570_v53, %v1275_v52  ;;  %v1203_v61 = vld [vmem:[#allocation5 + $0x120] sm:$0xf]  ;;  %v1552_v63 = vld [vmem:[#allocation5 + $0x124] sm:$0xf0]  ;;  %v1076_v4 = vor.u32 %v1520_v60, %v1075_v59 }
  0x23   :  { %696 = vmatpush.bf16.msra.mxu0 %v1092_v44  ;;  %v1148_v62 = vor.u32 %v1538_v55, %v1147_v54  ;;  %v1267_v0 = vld [vmem:[#allocation5 + $0x1a0] sm:$0xf]  ;;  %v1568_v1 = vld [vmem:[#allocation5 + $0x1a4] sm:$0xf0]  ;;  %v1204_v5 = vor.u32 %v1552_v63, %v1203_v61  ;;  %v1067_v7 = vld [vmem:[#allocation5 + $0x10] sm:$0xf] }
  0x24   :  { %722 = vmatpush.bf16.msra.mxu2 %v1220_v45  ;;  %v1139_v2 = vld [vmem:[#allocation5 + $0xa0] sm:$0xf]  ;;  %v1536_v3 = vld [vmem:[#allocation5 + $0xa4] sm:$0xf0]  ;;  %v1268_v6 = vor.u32 %v1568_v1, %v1267_v0  ;;  %v1518_v8 = vld [vmem:[#allocation5 + $0x14] sm:$0xf0] }
  0x25   :  { %735 = vmatpush.bf16.msra.mxu3 %v1284_v46  ;;  %v1195_v9 = vld [vmem:[#allocation5 + $0x110] sm:$0xf]  ;;  %v1140_v10 = vor.u32 %v1536_v3, %v1139_v2  ;;  %v1550_v11 = vld [vmem:[#allocation5 + $0x114] sm:$0xf0]  ;;  %v1068_v16 = vor.u32 %v1518_v8, %v1067_v7  ;;  %v1059_v17 = vld [vmem:[#allocation5] sm:$0xf] }
  0x26   :  { %709 = vmatpush.bf16.msra.mxu1 %v1156_v50  ;;  %v1259_v12 = vld [vmem:[#allocation5 + $0x190] sm:$0xf]  ;;  %v1566_v13 = vld [vmem:[#allocation5 + $0x194] sm:$0xf0]  ;;  %v1516_v18 = vld [vmem:[#allocation5 + $0x4] sm:$0xf0]  ;;  %v1196_v20 = vor.u32 %v1550_v11, %v1195_v9 }
  0x27   :  { %697 = vmatpush.bf16.msra.mxu0 %v1084_v56  ;;  %v1131_v14 = vld [vmem:[#allocation5 + $0x90] sm:$0xf]  ;;  %v1534_v15 = vld [vmem:[#allocation5 + $0x94] sm:$0xf0]  ;;  %v1187_v19 = vld [vmem:[#allocation5 + $0x100] sm:$0xf]  ;;  %v1260_v21 = vor.u32 %v1566_v13, %v1259_v12  ;;  %v1060_v32 = vor.u32 %v1516_v18, %v1059_v17 }
  0x28   :  { %723 = vmatpush.bf16.msra.mxu2 %v1212_v57  ;;  %v1548_v22 = vld [vmem:[#allocation5 + $0x104] sm:$0xf0]  ;;  %v1251_v23 = vld [vmem:[#allocation5 + $0x180] sm:$0xf]  ;;  %v1132_v25 = vor.u32 %v1534_v15, %v1131_v14  ;;  %v1371_v26 = vld [vmem:[#allocation5 + $0x270] sm:$0xf] }
  0x29   :  { %736 = vmatpush.bf16.msra.mxu3 %v1276_v58  ;;  %v1564_v24 = vld [vmem:[#allocation5 + $0x184] sm:$0xf0]  ;;  %v1594_v27 = vld [vmem:[#allocation5 + $0x274] sm:$0xf0]  ;;  %v1529_v28 = vld [vmem:[#allocation5 + $0x74] sm:$0xf]  ;;  %v1188_v36 = vor.u32 %v1548_v22, %v1187_v19 }
  0x2a   :  { %710 = vmatpush.bf16.msra.mxu1 %v1148_v62  ;;  %v1117_v29 = vld [vmem:[#allocation5 + $0x78] sm:$0xf0]  ;;  %v1123_v30 = vld [vmem:[#allocation5 + $0x80] sm:$0xf]  ;;  %v1532_v31 = vld [vmem:[#allocation5 + $0x84] sm:$0xf0]  ;;  %v1252_v37 = vor.u32 %v1564_v24, %v1251_v23  ;;  %v1372_v41 = vor.u32 %v1594_v27, %v1371_v26 }
  0x2b   :  { %698 = vmatpush.bf16.msra.mxu0 %v1076_v4  ;;  %v83_v33 = vld [vmem:[#allocation2 + $0x10] sm:$0xff]  ;;  %v1443_v34 = vld [vmem:[#allocation5 + $0x300] sm:$0xf]  ;;  %v1612_v35 = vld [vmem:[#allocation5 + $0x304] sm:$0xf0]  ;;  %v1120_v42 = vor.u32 %v1529_v28, %v1117_v29  ;;  %v1124_v46 = vor.u32 %v1532_v31, %v1123_v30  ;;  %vm689_vm0 = vcmask 130048  }
  0x2c   :  { %724 = vmatpush.bf16.msra.mxu2 %v1204_v5  ;;  %v1435_v38 = vld [vmem:[#allocation5 + $0x2f0] sm:$0xf]  ;;  %v1610_v39 = vld [vmem:[#allocation5 + $0x2f4] sm:$0xf0]  ;;  %v1545_v40 = vld [vmem:[#allocation5 + $0xf4] sm:$0xf]  ;;  %v1444_v47 = vor.u32 %v1612_v35, %v1443_v34  ;;  %v1818_v51 = vpack.c.bf16 %v83_v33, %v83_v33 }
  0x2d   :  { %737 = vmatpush.bf16.msra.mxu3 %v1268_v6  ;;  %v1181_v43 = vld [vmem:[#allocation5 + $0xf8] sm:$0xf0]  ;;  %v1363_v44 = vld [vmem:[#allocation5 + $0x260] sm:$0xf]  ;;  %v81_v45 = vld [vmem:[#allocation2] sm:$0xff]  ;;  %v1436_v52 = vor.u32 %v1610_v39, %v1435_v38  ;;  %s1775_s15 = smov [#allocation10]  }
  0x2e   :  { %711 = vmatpush.bf16.msra.mxu1 %v1140_v10  ;;  %v1592_v48 = vld [vmem:[#allocation5 + $0x264] sm:$0xf0]  ;;  %v1527_v49 = vld [vmem:[#allocation5 + $0x64] sm:$0xf]  ;;  %v1109_v50 = vld [vmem:[#allocation5 + $0x68] sm:$0xf0]  ;;  %v1184_v55 = vor.u32 %v1545_v40, %v1181_v43  ;;  %v1820_v58 = vpack.c.bf16 %v81_v45, %v81_v45 }
  0x2f   :  { %699 = vmatpush.bf16.msra.mxu0 %v1068_v16  ;;  %v84_v53 = vld [vmem:[#allocation2 + $0x18] sm:$0xff]  ;;  %v82_v54 = vld [vmem:[#allocation2 + $0x8] sm:$0xff]  ;;  %v1608_v57 = vld [vmem:[#allocation5 + $0x2e4] sm:$0xf0]  ;;  %v1364_v59 = vor.u32 %v1592_v48, %v1363_v44  ;;  %v1112_v60 = vor.u32 %v1527_v49, %v1109_v50  ;;  %s1043_s16 = sshll.u32 %s1775_s15, 4  ;;  %s1045_s19 = sshll.u32 %s1859_s5, 4  ;;  %s1044_s16 = int_to_ptr.vmem [resolvable:$true] %s1043_s16  ;;  %s1046_s19 = int_to_ptr.hbm [resolvable:$true] %s1045_s19 }
  0x30   :  { %725 = vmatpush.bf16.msra.mxu2 %v1196_v20  ;;  %v1427_v56 = vld [vmem:[#allocation5 + $0x2e0] sm:$0xf]  ;;  %v1543_v61 = vld [vmem:[#allocation5 + $0xe4] sm:$0xf]  ;;  %v1173_v62 = vld [vmem:[#allocation5 + $0xe8] sm:$0xf0]  ;;  %v1822_v3 = vpack.c.bf16 %v84_v53, %v84_v53  ;;  %v1824_v4 = vpack.c.bf16 %v82_v54, %v82_v54 }
  0x31   :  { %738 = vmatpush.bf16.msra.mxu3 %v1260_v21  ;;  %v1355_v63 = vld [vmem:[#allocation5 + $0x250] sm:$0xf]  ;;  %v1590_v0 = vld [vmem:[#allocation5 + $0x254] sm:$0xf0]  ;;  %v1525_v1 = vld [vmem:[#allocation5 + $0x54] sm:$0xf]  ;;  %v1428_v5 = vor.u32 %v1608_v57, %v1427_v56  ;;  %v1176_v6 = vor.u32 %v1543_v61, %v1173_v62 }
  0x32   :  { %712 = vmatpush.bf16.msra.mxu1 %v1132_v25  ;;  %v1101_v2 = vld [vmem:[#allocation5 + $0x58] sm:$0xf0]  ;;  %v1419_v7 = vld [vmem:[#allocation5 + $0x2d0] sm:$0xf]  ;;  %v1606_v8 = vld [vmem:[#allocation5 + $0x2d4] sm:$0xf0]  ;;  %v1356_v9 = vor.u32 %v1590_v0, %v1355_v63 }
  0x33   :  { %700 = vmatpush.bf16.msra.mxu0 %v1060_v32  ;;  %v1104_v10 = vor.u32 %v1525_v1, %v1101_v2  ;;  %v1541_v11 = vld [vmem:[#allocation5 + $0xd4] sm:$0xf]  ;;  %v1165_v12 = vld [vmem:[#allocation5 + $0xd8] sm:$0xf0]  ;;  %v1347_v13 = vld [vmem:[#allocation5 + $0x240] sm:$0xf]  ;;  %v1420_v17 = vor.u32 %v1606_v8, %v1419_v7 }
  0x34   :  { %726 = vmatpush.bf16.msra.mxu2 %v1188_v36  ;;  %v1588_v14 = vld [vmem:[#allocation5 + $0x244] sm:$0xf0]  ;;  %v1523_v15 = vld [vmem:[#allocation5 + $0x44] sm:$0xf]  ;;  %v1093_v16 = vld [vmem:[#allocation5 + $0x48] sm:$0xf0]  ;;  %v1168_v18 = vor.u32 %v1541_v11, %v1165_v12 }
  0x35   :  { %739 = vmatpush.bf16.msra.mxu3 %v1252_v37  ;;  %v1411_v19 = vld [vmem:[#allocation5 + $0x2c0] sm:$0xf]  ;;  %v1604_v20 = vld [vmem:[#allocation5 + $0x2c4] sm:$0xf0]  ;;  %v1348_v21 = vor.u32 %v1588_v14, %v1347_v13  ;;  %v1096_v22 = vor.u32 %v1523_v15, %v1093_v16  ;;  %v1539_v23 = vld [vmem:[#allocation5 + $0xc4] sm:$0xf] }
  0x36   :  { %713 = vmatpush.bf16.msra.mxu1 %v1124_v46  ;;  %701 = vmatmul.bf16.vlgmr.msra.gmra.mxu0 %v1820_v58  ;;  %v1157_v24 = vld [vmem:[#allocation5 + $0xc8] sm:$0xf0]  ;;  %v1339_v25 = vld [vmem:[#allocation5 + $0x230] sm:$0xf]  ;;  %v1586_v26 = vld [vmem:[#allocation5 + $0x234] sm:$0xf0]  ;;  %v1412_v29 = vor.u32 %v1604_v20, %v1411_v19 }
  0x37   :  { %745 = vmatpush.bf16.msrb.mxu0 %v1372_v41  ;;  %727 = vmatmul.bf16.vlgmr.msra.gmra.mxu2 %v1818_v51  ;;  %v1521_v27 = vld [vmem:[#allocation5 + $0x34] sm:$0xf]  ;;  %v1085_v28 = vld [vmem:[#allocation5 + $0x38] sm:$0xf0]  ;;  %v1160_v30 = vor.u32 %v1539_v23, %v1157_v24  ;;  %v1403_v31 = vld [vmem:[#allocation5 + $0x2b0] sm:$0xf]  ;;  %v1340_v34 = vor.u32 %v1586_v26, %v1339_v25 }
  0x38   :  { %778 = vmatpush.bf16.msrb.mxu2 %v1444_v47  ;;  %740 = vmatmul.bf16.vlgmr.msra.gmra.mxu3 %v1822_v3  ;;  %v1602_v32 = vld [vmem:[#allocation5 + $0x2b4] sm:$0xf0]  ;;  %v1088_v35 = vor.u32 %v1521_v27, %v1085_v28  ;;  %v1537_v36 = vld [vmem:[#allocation5 + $0xb4] sm:$0xf]  ;;  %v1149_v37 = vld [vmem:[#allocation5 + $0xb8] sm:$0xf0] }
  0x39   :  { %784 = vmatpush.bf16.msrb.mxu3 %v1120_v42  ;;  %714 = vmatmul.bf16.vlgmr.msra.gmra.mxu1 %v1824_v4  ;;  %v87_v33 = vld [vmem:[#allocation2 + $0x30] sm:$0xff]  ;;  %v1331_v38 = vld [vmem:[#allocation5 + $0x220] sm:$0xf]  ;;  %v1584_v39 = vld [vmem:[#allocation5 + $0x224] sm:$0xf0]  ;;  %v1404_v42 = vor.u32 %v1602_v32, %v1403_v31  ;;  %v1152_v44 = vor.u32 %v1537_v36, %v1149_v37 }
  0x3a   :  { %758 = vmatpush.bf16.msrb.mxu1 %v1436_v52  ;;  %v1519_v40 = vld [vmem:[#allocation5 + $0x24] sm:$0xf]  ;;  %v1077_v41 = vld [vmem:[#allocation5 + $0x28] sm:$0xf0]  ;;  %v1830_v43 = vpack.c.bf16 %v87_v33, %v87_v33  ;;  %v1395_v45 = vld [vmem:[#allocation5 + $0x2a0] sm:$0xf]  ;;  %v1332_v47 = vor.u32 %v1584_v39, %v1331_v38 }
  0x3b   :  { %746 = vmatpush.bf16.msrb.mxu0 %v1364_v59  ;;  %v1600_v46 = vld [vmem:[#allocation5 + $0x2a4] sm:$0xf0]  ;;  %v1080_v48 = vor.u32 %v1519_v40, %v1077_v41  ;;  %v1535_v49 = vld [vmem:[#allocation5 + $0xa4] sm:$0xf]  ;;  %v1141_v50 = vld [vmem:[#allocation5 + $0xa8] sm:$0xf0] }
  0x3c   :  { %797 = vmatpush.bf16.msra.mxu2 %v1184_v55  ;;  %v1323_v52 = vld [vmem:[#allocation5 + $0x210] sm:$0xf]  ;;  %v1582_v53 = vld [vmem:[#allocation5 + $0x214] sm:$0xf0]  ;;  %v1517_v54 = vld [vmem:[#allocation5 + $0x14] sm:$0xf]  ;;  %v1396_v56 = vor.u32 %v1600_v46, %v1395_v45  ;;  %v1144_v57 = vor.u32 %v1535_v49, %v1141_v50 }
  0x3d   :  { %785 = vmatpush.bf16.msrb.mxu3 %v1112_v60  ;;  %v1069_v55 = vld [vmem:[#allocation5 + $0x18] sm:$0xf0]  ;;  %v1387_v59 = vld [vmem:[#allocation5 + $0x290] sm:$0xf]  ;;  %v1598_v60 = vld [vmem:[#allocation5 + $0x294] sm:$0xf0]  ;;  %v1324_v62 = vor.u32 %v1582_v53, %v1323_v52 }
  0x3e   :  { %759 = vmatpush.bf16.msrb.mxu1 %v1428_v5  ;;  %v1533_v61 = vld [vmem:[#allocation5 + $0x94] sm:$0xf]  ;;  %v1072_v63 = vor.u32 %v1517_v54, %v1069_v55  ;;  %v1133_v0 = vld [vmem:[#allocation5 + $0x98] sm:$0xf0]  ;;  %v1315_v1 = vld [vmem:[#allocation5 + $0x200] sm:$0xf]  ;;  %v1388_v8 = vor.u32 %v1598_v60, %v1387_v59 }
  0x3f   :  { %747 = vmatpush.bf16.msrb.mxu0 %v1356_v9  ;;  %v1580_v2 = vld [vmem:[#allocation5 + $0x204] sm:$0xf0]  ;;  %v1515_v5 = vld [vmem:[#allocation5 + $0x4] sm:$0xf]  ;;  %v1561_v7 = vld [vmem:[#allocation5 + $0x174] sm:$0xf]  ;;  %v1136_v12 = vor.u32 %v1533_v61, %v1133_v0 }
  0x40   :  { %798 = vmatpush.bf16.msra.mxu2 %v1176_v6  ;;  %v1061_v6 = vld [vmem:[#allocation5 + $0x8] sm:$0xf0]  ;;  %v1245_v9 = vld [vmem:[#allocation5 + $0x178] sm:$0xf0]  ;;  %v1379_v13 = vld [vmem:[#allocation5 + $0x280] sm:$0xf]  ;;  %v1316_v16 = vor.u32 %v1580_v2, %v1315_v1 }
  0x41   :  { %786 = vmatpush.bf16.msrb.mxu3 %v1104_v10  ;;  %v1593_v10 = vld [vmem:[#allocation5 + $0x274] sm:$0xf]  ;;  %v1373_v11 = vld [vmem:[#allocation5 + $0x278] sm:$0xf0]  ;;  %v1596_v14 = vld [vmem:[#allocation5 + $0x284] sm:$0xf0] }
  0x42   :  { %760 = vmatpush.bf16.msrb.mxu1 %v1420_v17  ;;  %v85_v15 = vld [vmem:[#allocation2 + $0x20] sm:$0xff]  ;;  %v1064_v17 = vor.u32 %v1515_v5, %v1061_v6  ;;  %v1577_v20 = vld [vmem:[#allocation5 + $0x1f4] sm:$0xf]  ;;  %v1309_v23 = vld [vmem:[#allocation5 + $0x1f8] sm:$0xf0]  ;;  %v1380_v26 = vor.u32 %v1596_v14, %v1379_v13 }
  0x43   :  { %748 = vmatpush.bf16.msrb.mxu0 %v1348_v21  ;;  %v1125_v19 = vld [vmem:[#allocation5 + $0x88] sm:$0xf0]  ;;  %v1248_v21 = vor.u32 %v1561_v7, %v1245_v9  ;;  %v1609_v24 = vld [vmem:[#allocation5 + $0x2f4] sm:$0xf]  ;;  %v1437_v25 = vld [vmem:[#allocation5 + $0x2f8] sm:$0xf0] }
  0x44   :  { %799 = vmatpush.bf16.msra.mxu2 %v1168_v18  ;;  %v1531_v18 = vld [vmem:[#allocation5 + $0x84] sm:$0xf]  ;;  %v86_v27 = vld [vmem:[#allocation2 + $0x28] sm:$0xff]  ;;  %v1365_v33 = vld [vmem:[#allocation5 + $0x268] sm:$0xf0] }
  0x45   :  { %787 = vmatpush.bf16.msrb.mxu3 %v1096_v22  ;;  %v1376_v22 = vor.u32 %v1593_v10, %v1373_v11  ;;  %v1559_v28 = vld [vmem:[#allocation5 + $0x164] sm:$0xf]  ;;  %v1128_v31 = vor.u32 %v1531_v18, %v1125_v19  ;;  %v1836_v37 = vpack.c.bf16 %v86_v27, %v86_v27  ;;  %v1301_v39 = vld [vmem:[#allocation5 + $0x1e8] sm:$0xf0]  ;;  %v1229_v45 = vld [vmem:[#allocation5 + $0x158] sm:$0xf0] }
  0x46   :  { %761 = vmatpush.bf16.msrb.mxu1 %v1412_v29  ;;  %v1237_v29 = vld [vmem:[#allocation5 + $0x168] sm:$0xf0]  ;;  %v1591_v32 = vld [vmem:[#allocation5 + $0x264] sm:$0xf]  ;;  %v1589_v46 = vld [vmem:[#allocation5 + $0x254] sm:$0xf] }
  0x47   :  { %749 = vmatpush.bf16.msrb.mxu0 %v1340_v34  ;;  %1449 = vmatmul.msk.bf16.vlgmr.msrb.gmra.mxu2 %vm689_vm0, %v1830_v43  ;;  %v1312_v34 = vor.u32 %v1577_v20, %v1309_v23  ;;  %v1575_v36 = vld [vmem:[#allocation5 + $0x1e4] sm:$0xf]  ;;  %v1240_v38 = vor.u32 %v1559_v28, %v1237_v29  ;;  %v1429_v41 = vld [vmem:[#allocation5 + $0x2e8] sm:$0xf0]  ;;  %v1573_v50 = vld [vmem:[#allocation5 + $0x1d4] sm:$0xf] }
  0x48   :  { %800 = vmatpush.bf16.msra.mxu2 %v1160_v30  ;;  %v1834_v30 = vpack.c.bf16 %v85_v15, %v85_v15  ;;  %v1607_v40 = vld [vmem:[#allocation5 + $0x2e4] sm:$0xf]  ;;  %v1293_v53 = vld [vmem:[#allocation5 + $0x1d8] sm:$0xf0]  ;;  %v1605_v54 = vld [vmem:[#allocation5 + $0x2d4] sm:$0xf] }
  0x49   :  { %788 = vmatpush.bf16.msrb.mxu3 %v1088_v35  ;;  %v1440_v35 = vor.u32 %v1609_v24, %v1437_v25  ;;  %v1432_v49 = vor.u32 %v1607_v40, %v1429_v41  ;;  %v1421_v55 = vld [vmem:[#allocation5 + $0x2d8] sm:$0xf0]  ;;  %v1221_v59 = vld [vmem:[#allocation5 + $0x148] sm:$0xf0]  ;;  %v1587_v60 = vld [vmem:[#allocation5 + $0x244] sm:$0xf] }
  0x4a   :  { %762 = vmatpush.bf16.msrb.mxu1 %v1404_v42  ;;  %v1368_v42 = vor.u32 %v1591_v32, %v1365_v33  ;;  %v1349_v61 = vld [vmem:[#allocation5 + $0x248] sm:$0xf0]  ;;  %v1571_v0 = vld [vmem:[#allocation5 + $0x1c4] sm:$0xf]  ;;  %v1213_v9 = vld [vmem:[#allocation5 + $0x138] sm:$0xf0] }
  0x4b   :  { %750 = vmatpush.bf16.msrb.mxu0 %v1332_v47  ;;  %v1357_v47 = vld [vmem:[#allocation5 + $0x258] sm:$0xf0]  ;;  %v1285_v2 = vld [vmem:[#allocation5 + $0x1c8] sm:$0xf0]  ;;  %v1603_v5 = vld [vmem:[#allocation5 + $0x2c4] sm:$0xf]  ;;  %v1352_v7 = vor.u32 %v1587_v60, %v1349_v61 }
  0x4c   :  { %801 = vmatpush.bf16.msra.mxu2 %v1152_v44  ;;  %v1557_v44 = vld [vmem:[#allocation5 + $0x154] sm:$0xf]  ;;  %v1413_v6 = vld [vmem:[#allocation5 + $0x2c8] sm:$0xf0]  ;;  %v1288_v11 = vor.u32 %v1571_v0, %v1285_v2  ;;  %v1277_v14 = vld [vmem:[#allocation5 + $0x1b8] sm:$0xf0] }
  0x4d   :  { %789 = vmatpush.bf16.msrb.mxu3 %v1080_v48  ;;  %v1304_v48 = vor.u32 %v1575_v36, %v1301_v39  ;;  %v1232_v52 = vor.u32 %v1557_v44, %v1229_v45  ;;  %v1585_v10 = vld [vmem:[#allocation5 + $0x234] sm:$0xf]  ;;  %v1551_v18 = vld [vmem:[#allocation5 + $0x124] sm:$0xf]  ;;  %v1205_v19 = vld [vmem:[#allocation5 + $0x128] sm:$0xf0] }
  0x4e   :  { %763 = vmatpush.bf16.msrb.mxu1 %v1396_v56  ;;  %v1360_v56 = vor.u32 %v1589_v46, %v1357_v47  ;;  %v1601_v15 = vld [vmem:[#allocation5 + $0x2b4] sm:$0xf]  ;;  %v1583_v20 = vld [vmem:[#allocation5 + $0x224] sm:$0xf]  ;;  %v1208_v25 = vor.u32 %v1551_v18, %v1205_v19  ;;  %v1397_v28 = vld [vmem:[#allocation5 + $0x2a8] sm:$0xf0] }
  0x4f   :  { %751 = vmatpush.bf16.msrb.mxu0 %v1324_v62  ;;  %v1296_v62 = vor.u32 %v1573_v50, %v1293_v53  ;;  %v1567_v24 = vld [vmem:[#allocation5 + $0x1a4] sm:$0xf]  ;;  %v1197_v32 = vld [vmem:[#allocation5 + $0x118] sm:$0xf0]  ;;  %v1581_v33 = vld [vmem:[#allocation5 + $0x214] sm:$0xf] }
  0x50   :  { %802 = vmatpush.bf16.msra.mxu2 %v1144_v57  ;;  %v1555_v57 = vld [vmem:[#allocation5 + $0x144] sm:$0xf]  ;;  %v1261_v40 = vld [vmem:[#allocation5 + $0x198] sm:$0xf0]  ;;  %v1597_v41 = vld [vmem:[#allocation5 + $0x294] sm:$0xf] }
  0x51   :  { %790 = vmatpush.bf16.msrb.mxu3 %v1072_v63  ;;  %v1424_v63 = vor.u32 %v1605_v54, %v1421_v55  ;;  %v1224_v1 = vor.u32 %v1555_v57, %v1221_v59  ;;  %v1599_v27 = vld [vmem:[#allocation5 + $0x2a4] sm:$0xf]  ;;  %v1189_v46 = vld [vmem:[#allocation5 + $0x108] sm:$0xf0]  ;;  %v1618_v2 = vld [vmem:[#allocation8 + $0x28] sm:$0xff] }
  0x52   :  { %764 = vmatpush.bf16.msrb.mxu1 %v1388_v8  ;;  %v1553_v8 = vld [vmem:[#allocation5 + $0x134] sm:$0xf]  ;;  %v1400_v36 = vor.u32 %v1599_v27, %v1397_v28  ;;  %v1547_v45 = vld [vmem:[#allocation5 + $0x104] sm:$0xf]  ;;  %v1445_v50 = vld [vmem:[#allocation5 + $0x308] sm:$0xf0] }
  0x53   :  { %752 = vmatpush.bf16.msrb.mxu0 %v1316_v16  ;;  %v1216_v13 = vor.u32 %v1553_v8, %v1213_v9  ;;  %v1405_v16 = vld [vmem:[#allocation5 + $0x2b8] sm:$0xf0]  ;;  %v1579_v47 = vld [vmem:[#allocation5 + $0x204] sm:$0xf]  ;;  %v1192_v54 = vor.u32 %v1547_v45, %v1189_v46  ;;  %v1381_v60 = vld [vmem:[#allocation5 + $0x288] sm:$0xf0] }
  0x54   :  { %803 = vmatpush.bf16.msra.mxu2 %v1136_v12  ;;  %v1569_v12 = vld [vmem:[#allocation5 + $0x1b4] sm:$0xf]  ;;  %v1408_v23 = vor.u32 %v1601_v15, %v1405_v16  ;;  %v1563_v55 = vld [vmem:[#allocation5 + $0x184] sm:$0xf]  ;;  %v1620_v0 = vld [vmem:[#allocation8 + $0x38] sm:$0xff] }
  0x55   :  { %791 = vmatpush.bf16.msrb.mxu3 %v1064_v17  ;;  %v1595_v59 = vld [vmem:[#allocation5 + $0x284] sm:$0xf]  ;;  %v1626_v19 = vld [vmem:[#allocation8 + $0x68] sm:$0xff]  ;;  %v1624_v27 = vld [vmem:[#allocation8 + $0x58] sm:$0xff] }
  0x56   :  { %765 = vmatpush.bf16.msrb.mxu1 %v1380_v26  ;;  %753 = vmatmul.bf16.vlgmr.msrb.gmra.mxu0 %v1834_v30  ;;  %v1269_v26 = vld [vmem:[#allocation5 + $0x1a8] sm:$0xf0] }
  0x57   :  { %810 = vmatpush.bf16.msra.mxu0 %v1248_v21  ;;  %v1333_v21 = vld [vmem:[#allocation5 + $0x228] sm:$0xf0] }
  0x58   :  { %804 = vmatpush.bf16.msra.mxu2 %v1128_v31  ;;  %792 = vmatmul.bf16.vlgmr.msrb.gmra.mxu3 %v1820_v58  ;;  %v1416_v58 = vor.u32 %v1603_v5, %v1413_v6  ;;  %v1336_v29 = vor.u32 %v1583_v20, %v1333_v21  ;;  %v1549_v31 = vld [vmem:[#allocation5 + $0x114] sm:$0xf]  ;;  %v1616_v6 = vld [vmem:[#allocation8 + $0x18] sm:$0xff] }
  0x59   :  { %836 = vmatpush.bf16.msra.mxu3 %v1376_v22  ;;  %766 = vmatmul.bf16.vlgmr.msrb.gmra.mxu1 %v1836_v37  ;;  %v1280_v22 = vor.u32 %v1569_v12, %v1277_v14  ;;  %v1200_v39 = vor.u32 %v1549_v31, %v1197_v32  ;;  %v1617_v5 = vld [vmem:[#allocation8 + $0x20] sm:$0xff]  ;;  %v1623_v32 = vld [vmem:[#allocation8 + $0x50] sm:$0xff] }
  0x5a   :  { %823 = vmatpush.bf16.msra.mxu1 %v1312_v34  ;;  %v1325_v34 = vld [vmem:[#allocation5 + $0x218] sm:$0xf0] }
  0x5b   :  { %811 = vmatpush.bf16.msra.mxu0 %v1240_v38  ;;  %805 = vmatmul.bf16.vlgmr.msra.gmra.mxu2 %v1824_v4  ;;  %v1341_v4 = vld [vmem:[#allocation5 + $0x238] sm:$0xf0]  ;;  %v1565_v38 = vld [vmem:[#allocation5 + $0x194] sm:$0xf]  ;;  %v1328_v44 = vor.u32 %v1581_v33, %v1325_v34 }
  0x5c   :  { %849 = vmatpush.bf16.msrb.mxu2 %v1440_v35  ;;  %v1344_v17 = vor.u32 %v1585_v10, %v1341_v4  ;;  %v1272_v35 = vor.u32 %v1567_v24, %v1269_v26  ;;  %v1628_v4 = vld [vmem:[#allocation8 + $0x78] sm:$0xff] }
  0x5d   :  { %837 = vmatpush.bf16.msra.mxu3 %v1368_v42  ;;  %v1389_v42 = vld [vmem:[#allocation5 + $0x298] sm:$0xf0] }
  0x5e   :  { %824 = vmatpush.bf16.msra.mxu1 %v1304_v48  ;;  %v1317_v48 = vld [vmem:[#allocation5 + $0x208] sm:$0xf0]  ;;  %v1392_v53 = vor.u32 %v1597_v41, %v1389_v42 }
  0x5f   :  { %812 = vmatpush.bf16.msra.mxu0 %v1232_v52  ;;  %v1264_v52 = vor.u32 %v1565_v38, %v1261_v40  ;;  %v1320_v57 = vor.u32 %v1579_v47, %v1317_v48  ;;  %v1622_v38 = vld [vmem:[#allocation8 + $0x48] sm:$0xff] }
  0x60   :  { %850 = vmatpush.bf16.msrb.mxu2 %v1432_v49  ;;  %v1611_v49 = vld [vmem:[#allocation5 + $0x304] sm:$0xf] }
  0x61   :  { %838 = vmatpush.bf16.msra.mxu3 %v1360_v56  ;;  %v1253_v56 = vld [vmem:[#allocation5 + $0x188] sm:$0xf0]  ;;  %v1448_v61 = vor.u32 %v1611_v49, %v1445_v50 }
  0x62   :  { %825 = vmatpush.bf16.msra.mxu1 %v1296_v62  ;;  %v1256_v62 = vor.u32 %v1563_v55, %v1253_v56 }
  0x63   :  { %813 = vmatpush.bf16.msra.mxu0 %v1224_v1  ;;  %v1619_v1 = vld [vmem:[#allocation8 + $0x30] sm:$0xff] }
  0x64   :  { %851 = vmatpush.bf16.msrb.mxu2 %v1424_v63  ;;  %v1384_v63 = vor.u32 %v1595_v59, %v1381_v60 }
  0x65   :  { %839 = vmatpush.bf16.msra.mxu3 %v1352_v7 }
  0x66   :  { %826 = vmatpush.bf16.msra.mxu1 %v1288_v11 }
  0x67   :  { %814 = vmatpush.bf16.msra.mxu0 %v1216_v13  ;;  %v1627_v13 = vld [vmem:[#allocation8 + $0x70] sm:$0xff] }
  0x68   :  { %852 = vmatpush.bf16.msrb.mxu2 %v1416_v58 }
  0x69   :  { %840 = vmatpush.bf16.msra.mxu3 %v1344_v17 }
  0x6a   :  { %827 = vmatpush.bf16.msra.mxu1 %v1280_v22  ;;  %v1625_v22 = vld [vmem:[#allocation8 + $0x60] sm:$0xff] }
  0x6b   :  { %815 = vmatpush.bf16.msra.mxu0 %v1208_v25 }
  0x6c   :  { %853 = vmatpush.bf16.msrb.mxu2 %v1408_v23 }
  0x6d   :  { %841 = vmatpush.bf16.msra.mxu3 %v1336_v29 }
  0x6e   :  { %828 = vmatpush.bf16.msra.mxu1 %v1272_v35 }
  0x6f   :  { %816 = vmatpush.bf16.msra.mxu0 %v1200_v39  ;;  %v1621_v39 = vld [vmem:[#allocation8 + $0x40] sm:$0xff] }
  0x70   :  { %854 = vmatpush.bf16.msrb.mxu2 %v1400_v36 }
  0x71   :  { %842 = vmatpush.bf16.msra.mxu3 %v1328_v44 }
  0x72   :  { %829 = vmatpush.bf16.msra.mxu1 %v1264_v52 }
  0x73   :  { %817 = vmatpush.bf16.msra.mxu0 %v1192_v54 }
  0x74   :  { %855 = vmatpush.bf16.msrb.mxu2 %v1392_v53 }
  0x75   :  { %843 = vmatpush.bf16.msra.mxu3 %v1320_v57 }
  0x76   :  { %830 = vmatpush.bf16.msra.mxu1 %v1256_v62  ;;  %818 = vmatmul.bf16.vlgmr.msra.gmra.mxu0 %v1818_v51  ;;  %v1615_v51 = vld [vmem:[#allocation8 + $0x10] sm:$0xff] }
  0x77   :  { %869 = vmatpush.bf16.msrb.mxu0 %v1448_v61 }
  0x78   :  { %844 = vmatmul.bf16.vlgmr.msra.gmra.mxu3 %v1834_v30  ;;  %856 = vmatpush.bf16.msrb.mxu2 %v1384_v63  ;;  %v1614_v30 = vld [vmem:[#allocation8 + $0x8] sm:$0xff] }
  0x79   :  { %831 = vmatmul.bf16.vlgmr.msra.gmra.mxu1 %v1822_v3  ;;  %1024 = vmatpush.bf16.msrb.mxu3 %v1628_v4 }
  0x7a   :  { %1011 = vmatpush.bf16.msrb.mxu1 %v1620_v0 }
  0x7b   :  { %857 = vmatmul.bf16.vlgmr.msrb.gmra.mxu2 %v1836_v37  ;;  %v1613_v37 = vld [vmem:[#allocation8] sm:$0xff] }
  0x7d   :  { %1025 = vmatpush.bf16.msrb.mxu3 %v1627_v13 }
  0x7e   :  { %1012 = vmatpush.bf16.msrb.mxu1 %v1619_v1 }
  0x81   :  { %1026 = vmatpush.bf16.msrb.mxu3 %v1626_v19 }
  0x82   :  { %1013 = vmatpush.bf16.msrb.mxu1 %v1618_v2 }
  0x85   :  { %1027 = vmatpush.bf16.msrb.mxu3 %v1625_v22 }
  0x86   :  { %1450 = vmatmul.msk.bf16.vlgmr.msrb.gmra.mxu0 %vm689_vm0, %v1830_v43  ;;  %1014 = vmatpush.bf16.msrb.mxu1 %v1617_v5  ;;  %v193_v43 = vld [vmem:[#allocation7] sm:$0x3]  ;;  %v1638_v5 = vld [vmem:[%s1858_s4] ss:$0 sm:$0xff] }
  0x87   :  { %v195_v58 = vperm.slane %v193_v43, 0  ;;  %v196_v42 = vperm.slane %v193_v43, 1 }
  0x89   :  { %1028 = vmatpush.bf16.msrb.mxu3 %v1624_v27 }
  0x8a   :  { %1015 = vmatpush.bf16.msrb.mxu1 %v1616_v6 }
  0x8d   :  { %1029 = vmatpush.bf16.msrb.mxu3 %v1623_v32 }
  0x8e   :  { %1016 = vmatpush.bf16.msrb.mxu1 %v1615_v51 }
  0x91   :  { %1030 = vmatpush.bf16.msrb.mxu3 %v1622_v38 }
  0x92   :  { %1017 = vmatpush.bf16.msrb.mxu1 %v1614_v30 }
  0x95   :  { %1031 = vmatpush.bf16.msrb.mxu3 %v1621_v39 }
  0x96   :  { %1018 = vmatpush.bf16.msrb.mxu1 %v1613_v37 }
  0xb3   :  { %v702_v7 = vpop.f32.mrf.mxu0 }
  0xb4   :  { %v703_v14 = vadd.f32 %v702_v7, %v195_v58 }
  0xb6   :  { %v715_v3 = vpop.f32.mrf.mxu1 }
  0xb7   :  { %v716_v16 = vadd.f32 %v715_v3, %v703_v14 }
  0xba   :  { %v728_v8 = vpop.f32.mrf.mxu2 }
  0xbb   :  { %v741_v9 = vpop.f32.mrf.mxu3  ;;  %v704_v10 = vpop.f32.mrf.mxu0  ;;  %v729_v18 = vadd.f32 %v728_v8, %v716_v16 }
  0xbd   :  { %v742_v20 = vadd.f32 %v741_v9, %v729_v18 }
  0xbe   :  { %v717_v11 = vpop.f32.mrf.mxu1 }
  0xc2   :  { %v730_v12 = vpop.f32.mrf.mxu2 }
  0xc3   :  { %v743_v15 = vpop.f32.mrf.mxu3 }
  0xca   :  { %v780_v17 = vpop.f32.mrf.mxu2 }
  0xd2   :  { %v782_v24 = vpop.f32.mrf.mxu2 }
  0xd3   :  { %v754_v21 = vpop.f32.mrf.mxu0 }
  0xd4   :  { %v755_v23 = vadd.f32 %v754_v21, %v742_v20 }
  0xd6   :  { %v767_v25 = vpop.f32.mrf.mxu1 }
  0xd7   :  { %v768_v26 = vadd.f32 %v767_v25, %v755_v23 }
  0xd9   :  { %v781_v28 = vadd.f32 %v780_v17, %v768_v26 }
  0xdb   :  { %v875_v29 = vmax.f32 %v781_v28, 0.0  ;;  %v756_v31 = vpop.f32.mrf.mxu0  ;;  %v793_v35 = vpop.f32.mrf.mxu3 }
  0xdc   :  { %v794_v44 = vadd.f32 %v793_v35, %v196_v42 }
  0xdd   :  { %v877_v33 = vpack.c.bf16 %v875_v29, %v875_v29 }
  0xde   :  { %v806_v34 = vpop.f32.mrf.mxu2  ;;  %v769_v36 = vpop.f32.mrf.mxu1 }
  0xdf   :  { %1019 = vmatmul.bf16.vlgmr.msrb.gmra.mxu1 %v877_v33  ;;  %v807_v46 = vadd.f32 %v806_v34, %v794_v44 }
  0xe3   :  { %v795_v41 = vpop.f32.mrf.mxu3 }
  0xe6   :  { %v808_v40 = vpop.f32.mrf.mxu2 }
  0xf3   :  { %v819_v45 = vpop.f32.mrf.mxu0 }
  0xf4   :  { %v820_v48 = vadd.f32 %v819_v45, %v807_v46 }
  0xf6   :  { %v832_v47 = vpop.f32.mrf.mxu1 }
  0xf7   :  { %v833_v52 = vadd.f32 %v832_v47, %v820_v48 }
  0xfb   :  { %v845_v49 = vpop.f32.mrf.mxu3  ;;  %v821_v50 = vpop.f32.mrf.mxu0 }
  0xfc   :  { %v846_v54 = vadd.f32 %v845_v49, %v833_v52 }
  0xfe   :  { %v858_v53 = vpop.f32.mrf.mxu2  ;;  %v834_v55 = vpop.f32.mrf.mxu1 }
  0xff   :  { %v859_v56 = vadd.f32 %v858_v53, %v846_v54 }
 0x103   :  { %v847_v57 = vpop.f32.mrf.mxu3  ;;  %v871_v59 = vpop.f32.mrf.mxu0 }
 0x104   :  { %v872_v60 = vadd.f32 %v871_v59, %v859_v56 }
 0x106   :  { %v860_v61 = vpop.f32.mrf.mxu2  ;;  %v876_v62 = vmax.f32 %v872_v60, 0.0 }
 0x108   :  { %v878_v63 = vpack.c.bf16 %v876_v62, %v876_v62 }
 0x10a   :  { %1032 = vmatmul.bf16.vlgmr.msrb.gmra.mxu3 %v878_v63 }
 0x10b   :  { %v873_v0 = vpop.f32.mrf.mxu0 }
 0x15c   :  { %v1020_v1 = vpop.f32.mrf.mxu1 }
 0x15d   :  { %v1021_v6 = vadd.f32 %v1638_v5, %v1020_v1 }
 0x164   :  { %v1022_v2 = vpop.f32.mrf.mxu1 }
 0x18d   :  { %v1033_v51 = vpop.f32.mrf.mxu3 }
 0x18e   :  { %v1034_v30 = vadd.f32 %v1033_v51, %v1021_v6 }
 0x190   :  { %1037 = vst [vmem:[#allocation10] sm:$0xff] %v1034_v30 }
 0x191   :  { %1048 = dma.vmem_to_hbm [thread:$0]  %s1044_s16, 128, %s1046_s19, [#allocation4]  }
 0x195   :  { %v1035_v7 = vpop.f32.mrf.mxu3 }
 0x196   :  { %1765 = dma.done.wait [#allocation4], 128  }
 0x197   :  { %1766 = vsyncadd [#allocation4], 4294967168 }
 0x198   :  { %1053 = vsyncpa [#allocation3], 1 }
 0x199   :  { %1054 = vsyncpa [#allocation6], 1 }
 0x19a   :  { %1055 = vsyncpa [#allocation9], 1 }
 0x19b   :  { %1056 = vsyncpa [#allocation4], 1 }

</bundles_post_ra>
